<compile_context>
chip_gen: v7x
topology: tpu7x:2x2x1
jax: 0.10.0
libtpu: 0.0.40
codegen_flags: <defaults>
</compile_context>

<pallas_src>
import functools

import jax
import jax.numpy as jnp
from jax.experimental import pallas as pl
from jax.experimental.pallas import tpu as pltpu

_LANE = 128  # lane-padded width of the adv|val output slab


def _leaky_relu(x, slope=0.01):
    return jnp.where(x > 0, x, slope * x)


# ----------------------------------------------------------------------------
# Kernel
# ----------------------------------------------------------------------------
def _dueling_kernel(x_ref, w1_ref, b1_ref, wb1_ref, bb1_ref,
                    wa2_ref, ba2_ref, wv2_ref, bv2_ref,
                    q_ref, psum_ref, *, hidden1, rows_last, needs_row_mask):
    """One batch tile: feature + fused branch-hidden matmuls (bf16 in, f32
    accumulate), adv on the MXU, val on the VPU/XLU, dueling combine."""
    # feature layer: (TB, S) @ (S, H0)
    h = jnp.dot(x_ref[...], w1_ref[...],
                preferred_element_type=jnp.float32) + b1_ref[...]
    h = _leaky_relu(h).astype(jnp.bfloat16)

    # fused branch hidden layers: [Wa1 | Wv1] -> (TB, 2*H1), f32
    hb = jnp.dot(h, wb1_ref[...],
                 preferred_element_type=jnp.float32) + bb1_ref[...]
    hb = _leaky_relu(hb)

    hb_a = hb[:, :hidden1].astype(jnp.bfloat16)   # advantage branch -> MXU
    hb_v = hb[:, hidden1:]                        # value branch     -> VPU/XLU

    # advantage output: lanes [0, A) hold adv, lanes >= A are structurally 0
    # (padded weight columns and bias lanes are zero).
    adv = jnp.dot(hb_a, wa2_ref[...],
                  preferred_element_type=jnp.float32) + ba2_ref[...]  # (TB, 128)

    # value output: broadcast-multiply + cross-lane reduce (no zero MXU passes)
    val = jnp.sum(hb_v * wv2_ref[...], axis=-1, keepdims=True) + bv2_ref[...]

    # lane-dense bf16 store; lanes >= A hold just `val` and are sliced off in
    # the wrapper -- do NOT widen the wrapper slice past action_dim.
    q_ref[...] = (adv + val).astype(q_ref.dtype)

    # per-tile partial sum of adv for the GLOBAL mean. Padded adv lanes are
    # exactly zero, so no lane mask is needed; only padded batch rows (final
    # tile, only when the batch was padded) must be excluded.
    if not needs_row_mask:
        partial = jnp.sum(adv)
        psum_ref[...] = jnp.broadcast_to(partial, psum_ref.shape)
    else:
        is_last = pl.program_id(0) == pl.num_programs(0) - 1

        @pl.when(jnp.logical_not(is_last))
        def _():
            partial = jnp.sum(adv)
            psum_ref[...] = jnp.broadcast_to(partial, psum_ref.shape)

        @pl.when(is_last)
        def _():
            row = jax.lax.broadcasted_iota(jnp.int32, adv.shape, 0)
            partial = jnp.sum(jnp.where(row < rows_last, adv, 0.0))
            psum_ref[...] = jnp.broadcast_to(partial, psum_ref.shape)


# ----------------------------------------------------------------------------
# Wrapper
# ----------------------------------------------------------------------------
def _pick_tiles(B, max_batch_tile):
    """Batch tiling: single full-array tile for small B; otherwise >= 2 tiles
    (so v7x megacore gets both TensorCores), capped at max_batch_tile rows."""
    if B <= 512:
        return B, B, 1
    half = -(-B // 2)
    tb = min(max_batch_tile, -(-half // 64) * 64)   # multiple of 64 (bf16-safe)
    bp = -(-B // tb) * tb
    return tb, bp, bp // tb


def dueling_dqn_forward(x, fp, action_dim, *, max_batch_tile=2048):
    """x: (B, state_dim) f32. fp: fused/bf16 params from prepare_params()."""
    B, S = x.shape
    H0 = fp["w1"].shape[1]
    H1 = fp["wa2"].shape[0]

    tb, bp, n_tiles = _pick_tiles(B, max_batch_tile)

    xb = x.astype(jnp.bfloat16)
    if bp != B:
        xb = jnp.pad(xb, ((0, bp - B), (0, 0)))

    rows_last = B - (n_tiles - 1) * tb
    kernel = functools.partial(_dueling_kernel, hidden1=H1,
                               rows_last=rows_last,
                               needs_row_mask=(bp != B))

    weight_args = (fp["w1"], fp["b1"], fp["wb1"], fp["bb1"],
                   fp["wa2"], fp["ba2"], fp["wv2"], fp["bv2"])
    in_specs = [pl.BlockSpec((tb, S), lambda i: (i, 0))]
    # weights/biases: constant block index -> stay VMEM-resident across grid
    in_specs += [pl.BlockSpec(w.shape, lambda i: (0, 0)) for w in weight_args]

    out_shape = (jax.ShapeDtypeStruct((bp, _LANE), jnp.bfloat16),        # q slab
                 jax.ShapeDtypeStruct((1, n_tiles * _LANE), jnp.float32))  # psums
    out_specs = (pl.BlockSpec((tb, _LANE), lambda i: (i, 0)),
                 pl.BlockSpec((1, _LANE), lambda i: (0, i)))

    weight_bytes = sum(int(w.size) * w.dtype.itemsize for w in weight_args)
    cost = pl.CostEstimate(
        flops=2 * bp * (S * H0 + H0 * 2 * H1 + H1 * _LANE + H1),
        transcendentals=0,
        bytes_accessed=int(bp * S * 2 + weight_bytes
                           + bp * _LANE * 2 + n_tiles * _LANE * 4),
    )

    q_raw, psums = pl.pallas_call(
        kernel,
        grid=(n_tiles,),
        in_specs=in_specs,
        out_specs=out_specs,
        out_shape=out_shape,
        compiler_params=pltpu.CompilerParams(
            dimension_semantics=("parallel",),      # megacore on v7x
            vmem_limit_bytes=48 * 1024 * 1024,      # < v7x 64 MiB, fine elsewhere
        ),
        cost_estimate=cost,
    )(xb, *weight_args)

    # finalize the GLOBAL adv mean (couples all batch tiles) and combine.
    adv_sum = jnp.sum(psums.reshape(n_tiles, _LANE)[:, 0])
    inv_count = 1.0 / (B * action_dim)              # compile-time constant
    return q_raw[:B, :action_dim].astype(jnp.float32) - adv_sum * inv_count


# ----------------------------------------------------------------------------
# Parameter construction / fusion
# ----------------------------------------------------------------------------
def init_params(key, state_dim, action_dim, hidden=(256, 256)):
    """PyTorch-style init: U(-1/sqrt(fan_in), 1/sqrt(fan_in))."""
    def linear(key, fan_in, fan_out):
        kw, kb = jax.random.split(key)
        bound = 1.0 / jnp.sqrt(jnp.float32(fan_in))
        w = jax.random.uniform(kw, (fan_in, fan_out), jnp.float32, -bound, bound)
        b = jax.random.uniform(kb, (1, fan_out), jnp.float32, -bound, bound)
        return w, b

    keys = jax.random.split(key, 5)
    w1, b1 = linear(keys[0], state_dim, hidden[0])
    wa1, ba1 = linear(keys[1], hidden[0], hidden[1])
    wa2, ba2 = linear(keys[2], hidden[1], action_dim)
    wv1, bv1 = linear(keys[3], hidden[0], hidden[1])
    wv2, bv2 = linear(keys[4], hidden[1], 1)
    return dict(w1=w1, b1=b1, wa1=wa1, ba1=ba1, wa2=wa2, ba2=ba2,
                wv1=wv1, bv1=bv1, wv2=wv2, bv2=bv2)


def prepare_params(p, action_dim):
    """Fuse the two branches into wide / lane-dense bf16 weights (done once)."""
    assert action_dim < _LANE, "action_dim must fit in one 128-lane slab"
    h1 = p["wa1"].shape[1]

    # fused branch hidden layers: [Wa1 | Wv1] -> (H0, 2*H1)
    wb1 = jnp.concatenate([p["wa1"], p["wv1"]], axis=1)
    bb1 = jnp.concatenate([p["ba1"], p["bv1"]], axis=1)

    # advantage output layer, lane-padded to 128; padded columns/lanes stay
    # exactly zero so the kernel's unmasked adv-sum is correct.
    wa2p = jnp.zeros((h1, _LANE), jnp.float32).at[:, :action_dim].set(p["wa2"])
    ba2p = jnp.zeros((1, _LANE), jnp.float32).at[:, :action_dim].set(p["ba2"])

    # value output layer as a VPU row (1, H1) + scalar bias (1, 1)
    wv2r = p["wv2"].reshape(1, h1).astype(jnp.float32)
    bv2 = p["bv2"].reshape(1, 1).astype(jnp.float32)

    return dict(
        w1=p["w1"].astype(jnp.bfloat16), b1=p["b1"].astype(jnp.float32),
        wb1=wb1.astype(jnp.bfloat16), bb1=bb1.astype(jnp.float32),
        wa2=wa2p.astype(jnp.bfloat16), ba2=ba2p,
        wv2=wv2r, bv2=bv2,
    )


# ----------------------------------------------------------------------------
# Reference (same bf16-input / f32-accumulate matmul recipe as the kernel)
# ----------------------------------------------------------------------------
def reference_forward(x, p):
    def mm(a, w):
        return jnp.dot(a.astype(jnp.bfloat16), w.astype(jnp.bfloat16),
                       preferred_element_type=jnp.float32)

    h = _leaky_relu(mm(x, p["w1"]) + p["b1"])
    adv = mm(_leaky_relu(mm(h, p["wa1"]) + p["ba1"]), p["wa2"]) + p["ba2"]
    val = mm(_leaky_relu(mm(h, p["wv1"]) + p["bv1"]), p["wv2"]) + p["bv2"]
    return val + adv - jnp.mean(adv)


if __name__ == "__main__":
    key = jax.random.PRNGKey(0)
    k_x, k_p, k_x2 = jax.random.split(key, 3)

    state_dim = 8
    action_dim = 4
    hidden = (256, 256)  # module default

    raw_params = init_params(k_p, state_dim, action_dim, hidden)
    fused_params = prepare_params(raw_params, action_dim)

    # small single-tile check (module-like shapes)
    batch = 2
    x = jax.random.normal(k_x, (batch, state_dim), jnp.float32)
    out = jax.block_until_ready(dueling_dqn_forward(x, fused_params, action_dim))
    ref = reference_forward(x, raw_params)
    assert out.shape == (batch, action_dim)
    assert jnp.allclose(out, ref, atol=1e-2, rtol=1e-2), (out, ref)

    # multi-tile check (exercises batch padding + final-tile row mask),
    # small tiles forced so it stays cheap.
    batch2 = 600
    x2 = jax.random.normal(k_x2, (batch2, state_dim), jnp.float32)
    out2 = jax.block_until_ready(
        dueling_dqn_forward(x2, fused_params, action_dim, max_batch_tile=320))
    ref2 = reference_forward(x2, raw_params)
    assert out2.shape == (batch2, action_dim)
    assert jnp.allclose(out2, ref2, atol=1e-2, rtol=1e-2)

    print("KERNEL_OK")
</pallas_src>

<mosaic_0001>
module attributes {stable_mosaic.version = 11 : i64} {
  func.func @_dueling_kernel(%arg0: i32, %arg1: memref<2x8xbf16, #tpu.memory_space<vmem>>, %arg2: memref<8x256xbf16, #tpu.memory_space<vmem>>, %arg3: memref<1x256xf32, #tpu.memory_space<vmem>>, %arg4: memref<256x512xbf16, #tpu.memory_space<vmem>>, %arg5: memref<1x512xf32, #tpu.memory_space<vmem>>, %arg6: memref<256x128xbf16, #tpu.memory_space<vmem>>, %arg7: memref<1x128xf32, #tpu.memory_space<vmem>>, %arg8: memref<1x256xf32, #tpu.memory_space<vmem>>, %arg9: memref<1x1xf32, #tpu.memory_space<vmem>>, %arg10: memref<2x128xbf16, #tpu.memory_space<vmem>>, %arg11: memref<1x128xf32, #tpu.memory_space<vmem>>) attributes {dimension_semantics = [#tpu.dimension_semantics<parallel>], iteration_bounds = array<i64: 1>, scalar_prefetch = 0 : i64, scratch_operands = 0 : i64, tpu.core_type = #tpu.core_type<tc>, window_params = [{transform_indices = @transform_0, window_bounds = array<i64: 2, 8>}, {pipeline_mode = #tpu.pipeline_mode<synchronous>, transform_indices = @transform_1, window_bounds = array<i64: 8, 256>}, {pipeline_mode = #tpu.pipeline_mode<synchronous>, transform_indices = @transform_2, window_bounds = array<i64: 1, 256>}, {pipeline_mode = #tpu.pipeline_mode<synchronous>, transform_indices = @transform_3, window_bounds = array<i64: 256, 512>}, {pipeline_mode = #tpu.pipeline_mode<synchronous>, transform_indices = @transform_4, window_bounds = array<i64: 1, 512>}, {pipeline_mode = #tpu.pipeline_mode<synchronous>, transform_indices = @transform_5, window_bounds = array<i64: 256, 128>}, {pipeline_mode = #tpu.pipeline_mode<synchronous>, transform_indices = @transform_6, window_bounds = array<i64: 1, 128>}, {pipeline_mode = #tpu.pipeline_mode<synchronous>, transform_indices = @transform_7, window_bounds = array<i64: 1, 256>}, {pipeline_mode = #tpu.pipeline_mode<synchronous>, transform_indices = @transform_8, window_bounds = array<i64: 1, 1>}, {transform_indices = @transform_9, window_bounds = array<i64: 2, 128>}, {transform_indices = @transform_10, window_bounds = array<i64: 1, 128>}]} {
    %c0 = arith.constant 0 : index
    %c0_0 = arith.constant 0 : index
    %0 = vector.load %arg1[%c0, %c0_0] : memref<2x8xbf16, #tpu.memory_space<vmem>>, vector<2x8xbf16>
    %c0_1 = arith.constant 0 : index
    %c0_2 = arith.constant 0 : index
    %1 = vector.load %arg2[%c0_1, %c0_2] : memref<8x256xbf16, #tpu.memory_space<vmem>>, vector<8x256xbf16>
    %cst = arith.constant dense<0.000000e+00> : vector<2x256xf32>
    %2 = tpu.matmul %0, %1, %cst {dimension_numbers = #tpu.dot_dimension_numbers<[1], [0], [0], [1], [0, 0, 1, 1], [], []>} : vector<2x8xbf16>, vector<8x256xbf16>, vector<2x256xf32> -> vector<2x256xf32>
    %c0_3 = arith.constant 0 : index
    %c0_4 = arith.constant 0 : index
    %3 = vector.load %arg3[%c0_3, %c0_4] : memref<1x256xf32, #tpu.memory_space<vmem>>, vector<1x256xf32>
    %4 = vector.broadcast %3 : vector<1x256xf32> to vector<2x256xf32>
    %5 = arith.addf %2, %4 : vector<2x256xf32>
    %cst_5 = arith.constant 0.000000e+00 : f32
    %6 = vector.broadcast %cst_5 : f32 to vector<2x256xf32>
    %7 = arith.cmpf ogt, %5, %6 : vector<2x256xf32>
    %cst_6 = arith.constant 0.00999999977 : f32
    %8 = vector.broadcast %cst_6 : f32 to vector<2x256xf32>
    %9 = arith.mulf %8, %5 : vector<2x256xf32>
    %10 = arith.select %7, %5, %9 : vector<2x256xi1>, vector<2x256xf32>
    %11 = arith.truncf %10 : vector<2x256xf32> to vector<2x256xbf16>
    %c0_7 = arith.constant 0 : index
    %c0_8 = arith.constant 0 : index
    %12 = vector.load %arg4[%c0_7, %c0_8] : memref<256x512xbf16, #tpu.memory_space<vmem>>, vector<256x512xbf16>
    %cst_9 = arith.constant dense<0.000000e+00> : vector<2x512xf32>
    %13 = tpu.matmul %11, %12, %cst_9 {dimension_numbers = #tpu.dot_dimension_numbers<[1], [0], [0], [1], [0, 0, 1, 1], [], []>} : vector<2x256xbf16>, vector<256x512xbf16>, vector<2x512xf32> -> vector<2x512xf32>
    %c0_10 = arith.constant 0 : index
    %c0_11 = arith.constant 0 : index
    %14 = vector.load %arg5[%c0_10, %c0_11] : memref<1x512xf32, #tpu.memory_space<vmem>>, vector<1x512xf32>
    %15 = vector.broadcast %14 : vector<1x512xf32> to vector<2x512xf32>
    %16 = arith.addf %13, %15 : vector<2x512xf32>
    %cst_12 = arith.constant 0.000000e+00 : f32
    %17 = vector.broadcast %cst_12 : f32 to vector<2x512xf32>
    %18 = arith.cmpf ogt, %16, %17 : vector<2x512xf32>
    %cst_13 = arith.constant 0.00999999977 : f32
    %19 = vector.broadcast %cst_13 : f32 to vector<2x512xf32>
    %20 = arith.mulf %19, %16 : vector<2x512xf32>
    %21 = arith.select %18, %16, %20 : vector<2x512xi1>, vector<2x512xf32>
    %22 = vector.extract_strided_slice %21 {offsets = [0, 0], sizes = [2, 256], strides = [1, 1]} : vector<2x512xf32> to vector<2x256xf32>
    %23 = arith.truncf %22 : vector<2x256xf32> to vector<2x256xbf16>
    %24 = vector.extract_strided_slice %21 {offsets = [0, 256], sizes = [2, 256], strides = [1, 1]} : vector<2x512xf32> to vector<2x256xf32>
    %c0_14 = arith.constant 0 : index
    %c0_15 = arith.constant 0 : index
    %25 = vector.load %arg6[%c0_14, %c0_15] : memref<256x128xbf16, #tpu.memory_space<vmem>>, vector<256x128xbf16>
    %cst_16 = arith.constant dense<0.000000e+00> : vector<2x128xf32>
    %26 = tpu.matmul %23, %25, %cst_16 {dimension_numbers = #tpu.dot_dimension_numbers<[1], [0], [0], [1], [0, 0, 1, 1], [], []>} : vector<2x256xbf16>, vector<256x128xbf16>, vector<2x128xf32> -> vector<2x128xf32>
    %c0_17 = arith.constant 0 : index
    %c0_18 = arith.constant 0 : index
    %27 = vector.load %arg7[%c0_17, %c0_18] : memref<1x128xf32, #tpu.memory_space<vmem>>, vector<1x128xf32>
    %28 = vector.broadcast %27 : vector<1x128xf32> to vector<2x128xf32>
    %29 = arith.addf %26, %28 : vector<2x128xf32>
    %c0_19 = arith.constant 0 : index
    %c0_20 = arith.constant 0 : index
    %30 = vector.load %arg8[%c0_19, %c0_20] : memref<1x256xf32, #tpu.memory_space<vmem>>, vector<1x256xf32>
    %31 = vector.broadcast %30 : vector<1x256xf32> to vector<2x256xf32>
    %32 = arith.mulf %24, %31 : vector<2x256xf32>
    %cst_21 = arith.constant dense<0.000000e+00> : vector<2xf32>
    %33 = vector.multi_reduction <add>, %32, %cst_21 [1] : vector<2x256xf32> to vector<2xf32>
    %34 = vector.shape_cast %33 : vector<2xf32> to vector<2x1xf32>
    %c0_22 = arith.constant 0 : index
    %c0_23 = arith.constant 0 : index
    %35 = vector.load %arg9[%c0_22, %c0_23] : memref<1x1xf32, #tpu.memory_space<vmem>>, vector<1x1xf32>
    %36 = vector.broadcast %35 : vector<1x1xf32> to vector<2x1xf32>
    %37 = arith.addf %34, %36 : vector<2x1xf32>
    %38 = vector.broadcast %37 : vector<2x1xf32> to vector<2x128xf32>
    %39 = arith.addf %29, %38 : vector<2x128xf32>
    %40 = arith.truncf %39 : vector<2x128xf32> to vector<2x128xbf16>
    %c0_24 = arith.constant 0 : index
    %c0_25 = arith.constant 0 : index
    %41 = vector.load %arg10[%c0_24, %c0_25] : memref<2x128xbf16, #tpu.memory_space<vmem>>, vector<2x128xbf16>
    tpu.vector_store %arg10[%c0_24, %c0_25], %40 {strides = array<i32>} : memref<2x128xbf16, #tpu.memory_space<vmem>>, vector<2x128xbf16>,
    %42 = vector.shape_cast %29 : vector<2x128xf32> to vector<1x2x128xf32>
    %cst_26 = arith.constant dense<0.000000e+00> : vector<1xf32>
    %43 = vector.multi_reduction <add>, %42, %cst_26 [1, 2] : vector<1x2x128xf32> to vector<1xf32>
    %44 = vector.shape_cast %43 : vector<1xf32> to vector<1x1x1xf32>
    %45 = vector.extract %44[0, 0, 0] : f32 from vector<1x1x1xf32>
    %46 = vector.broadcast %45 : f32 to vector<1x128xf32>
    %c0_27 = arith.constant 0 : index
    %c0_28 = arith.constant 0 : index
    %47 = vector.load %arg11[%c0_27, %c0_28] : memref<1x128xf32, #tpu.memory_space<vmem>>, vector<1x128xf32>
    tpu.vector_store %arg11[%c0_27, %c0_28], %46 {strides = array<i32>} : memref<1x128xf32, #tpu.memory_space<vmem>>, vector<1x128xf32>,
    return
  }
  func.func @transform_0(%arg0: i32) -> (i32, i32) {
    %c0_i32 = arith.constant 0 : i32
    %c0_i32_0 = arith.constant 0 : i32
    return %arg0, %c0_i32 : i32, i32
  }
  func.func @transform_1(%arg0: i32) -> (i32, i32) {
    %c0_i32 = arith.constant 0 : i32
    %c0_i32_0 = arith.constant 0 : i32
    %c0_i32_1 = arith.constant 0 : i32
    return %c0_i32, %c0_i32_0 : i32, i32
  }
  func.func @transform_2(%arg0: i32) -> (i32, i32) {
    %c0_i32 = arith.constant 0 : i32
    %c0_i32_0 = arith.constant 0 : i32
    %c0_i32_1 = arith.constant 0 : i32
    return %c0_i32, %c0_i32_0 : i32, i32
  }
  func.func @transform_3(%arg0: i32) -> (i32, i32) {
    %c0_i32 = arith.constant 0 : i32
    %c0_i32_0 = arith.constant 0 : i32
    %c0_i32_1 = arith.constant 0 : i32
    return %c0_i32, %c0_i32_0 : i32, i32
  }
  func.func @transform_4(%arg0: i32) -> (i32, i32) {
    %c0_i32 = arith.constant 0 : i32
    %c0_i32_0 = arith.constant 0 : i32
    %c0_i32_1 = arith.constant 0 : i32
    return %c0_i32, %c0_i32_0 : i32, i32
  }
  func.func @transform_5(%arg0: i32) -> (i32, i32) {
    %c0_i32 = arith.constant 0 : i32
    %c0_i32_0 = arith.constant 0 : i32
    %c0_i32_1 = arith.constant 0 : i32
    return %c0_i32, %c0_i32_0 : i32, i32
  }
  func.func @transform_6(%arg0: i32) -> (i32, i32) {
    %c0_i32 = arith.constant 0 : i32
    %c0_i32_0 = arith.constant 0 : i32
    %c0_i32_1 = arith.constant 0 : i32
    return %c0_i32, %c0_i32_0 : i32, i32
  }
  func.func @transform_7(%arg0: i32) -> (i32, i32) {
    %c0_i32 = arith.constant 0 : i32
    %c0_i32_0 = arith.constant 0 : i32
    %c0_i32_1 = arith.constant 0 : i32
    return %c0_i32, %c0_i32_0 : i32, i32
  }
  func.func @transform_8(%arg0: i32) -> (i32, i32) {
    %c0_i32 = arith.constant 0 : i32
    %c0_i32_0 = arith.constant 0 : i32
    %c0_i32_1 = arith.constant 0 : i32
    return %c0_i32, %c0_i32_0 : i32, i32
  }
  func.func @transform_9(%arg0: i32) -> (i32, i32) {
    %c0_i32 = arith.constant 0 : i32
    %c0_i32_0 = arith.constant 0 : i32
    return %arg0, %c0_i32 : i32, i32
  }
  func.func @transform_10(%arg0: i32) -> (i32, i32) {
    %c0_i32 = arith.constant 0 : i32
    %c0_i32_0 = arith.constant 0 : i32
    return %c0_i32, %arg0 : i32, i32
  }
}

</mosaic_0001>

<bundles_post_ra>
// kernel: tpu_custom_call.1
= control target key start
LH: loop header
LB: loop body
LE: loop exit
PB: predicated region body
PF: predicated region fallthrough
CT: control target
= control target key end

     0   :  { %s1422_s0 = inlined_call_operand.vmem [shape: bf16[2,8], index: 0, kind: input, shape index: {}]   ;;  %s1423_s1 = inlined_call_operand.hbm [shape: bf16[8,256], index: 1, kind: input, shape index: {}]   ;;  %s1424_s2 = inlined_call_operand.vmem [shape: f32[1,256], index: 2, kind: input, shape index: {}]   ;;  %s1425_s3 = inlined_call_operand.hbm [shape: bf16[256,512], index: 3, kind: input, shape index: {}]   ;;  %s1426_s4 = inlined_call_operand.vmem [shape: f32[1,512], index: 4, kind: input, shape index: {}]   ;;  %s1427_s5 = inlined_call_operand.hbm [shape: bf16[256,128], index: 5, kind: input, shape index: {}]   ;;  %s1428_s6 = inlined_call_operand.vmem [shape: f32[1,128], index: 6, kind: input, shape index: {}]   ;;  %s1429_s7 = inlined_call_operand.vmem [shape: f32[1,256], index: 7, kind: input, shape index: {}]   ;;  %s1430_s8 = inlined_call_operand.<no memory space> [shape: f32[1,1], index: 8, kind: input, shape index: {}]   ;;  %s1431_s9 = inlined_call_operand.hbm [shape: bf16[2,128], index: 9, kind: output, shape index: {0}]   ;;  %s1432_s10 = inlined_call_operand.hbm [shape: f32[1,128], index: 10, kind: output, shape index: {1}]  }
   0x1   :  { %v16_v0 = vstv %s1430_s8 }
   0x2   :  { %17 = vst [vmem:[#allocation2] sm:$0x1] %v16_v0 }
   0x3   :  { %18 = vsyncpa [#allocation4], 0 }
   0x4   :  { %19 = vsyncpa [#allocation7], 0 }
   0x5   :  { %20 = vsyncpa [#allocation5], 0 }
   0x6   :  { %21 = vsyncpa [#allocation11], 0  ;;  %s1266_s15 = smov [#allocation6]   ;;  %s1148_s19 = scalar_lea.hbm %s1425_s3, 8192 }
   0x7   :  { %s41_s16 = sshll.u32 %s1266_s15, 4  ;;  %p1149_p0 = scmp.ne.s32.totalorder %s1425_s3, %s1148_s19  ;;  %s42_s16 = int_to_ptr.vmem [resolvable:$true] %s41_s16 }
   0x8   :  { %p1152_p1 = scmp.lt.u32.totalorder %s1148_s19, %s1425_s3 }
   0xa   :  { %p1154_p2 = pnand %p1152_p1, %p1149_p0 }
   0xc   :  { %1157 = shalt.err (!%p1154_p2)
}
   0xd   :  { %s1158_s8 = scalar_lea.vmem %s42_s16, 8192  ;;  %p1163_p4 = scmp.lt.s32.totalorder %s42_s16, %s42_s16 }
   0xe   :  { %p1159_p3 = scmp.ne.s32.totalorder %s42_s16, %s1158_s8  ;;  %p1164_p5 = scmp.lt.s32.totalorder %s1158_s8, %s1158_s8 }
  0x10   :  { %p1165_p6 = por %p1164_p5, %p1163_p4 }
  0x12   :  { %p1166_p7 = pnand %p1165_p6, %p1159_p3 }
  0x14   :  { %1169 = shalt.err (!%p1166_p7)
}
  0x15   :  { %s1267_s24 = smov 256   ;;  %s1268_s25 = smov 16  }
  0x16   :  { %47 = dma.hbm_to_vmem [thread:$0]  %s1425_s3, 8192, %s42_s16, [#allocation7], %s1267_s24, %s1267_s24, %s1268_s25  }
  0x17   :  { %s1269_s28 = smov [#allocation3]   ;;  %s1270_s30 = smov [#allocation8]  }
  0x18   :  { %s30_s29 = sshll.u32 %s1269_s28, 4  ;;  %s55_s11 = sshll.u32 %s1270_s30, 4  ;;  %s31_s29 = int_to_ptr.vmem [resolvable:$true] %s30_s29  ;;  %s56_s11 = int_to_ptr.vmem [resolvable:$true] %s55_s11 }
  0x19   :  { %s1170_s14 = scalar_lea.hbm %s1423_s1, 128 }
  0x1a   :  { %p1171_p8 = scmp.ne.s32.totalorder %s1423_s1, %s1170_s14  ;;  %p1174_p9 = scmp.lt.u32.totalorder %s1170_s14, %s1423_s1 }
  0x1c   :  { %p1176_p10 = pnand %p1174_p9, %p1171_p8 }
  0x1e   :  { %1179 = shalt.err (!%p1176_p10)
}
  0x1f   :  { %s1180_s3 = scalar_lea.vmem %s31_s29, 128  ;;  %p1185_p12 = scmp.lt.s32.totalorder %s31_s29, %s31_s29 }
  0x20   :  { %p1181_p11 = scmp.ne.s32.totalorder %s31_s29, %s1180_s3  ;;  %p1186_p13 = scmp.lt.s32.totalorder %s1180_s3, %s1180_s3 }
  0x22   :  { %p1187_p0 = por %p1186_p13, %p1185_p12 }
  0x24   :  { %p1188_p1 = pnand %p1187_p0, %p1181_p11 }
  0x26   :  { %1191 = shalt.err (!%p1188_p1)
}
  0x27   :  { %33 = dma.hbm_to_vmem [thread:$0]  %s1423_s1, 128, %s31_s29, [#allocation4]  }
  0x28   :  { %s1192_s23 = scalar_lea.hbm %s1427_s5, 2048 }
  0x29   :  { %p1193_p2 = scmp.ne.s32.totalorder %s1427_s5, %s1192_s23  ;;  %p1196_p3 = scmp.lt.u32.totalorder %s1192_s23, %s1427_s5 }
  0x2b   :  { %p1198_p4 = pnand %p1196_p3, %p1193_p2 }
  0x2d   :  { %1201 = shalt.err (!%p1198_p4)
}
  0x2e   :  { %s1202_s27 = scalar_lea.vmem %s56_s11, 2048  ;;  %p1207_p6 = scmp.lt.s32.totalorder %s56_s11, %s56_s11 }
  0x2f   :  { %p1203_p5 = scmp.ne.s32.totalorder %s56_s11, %s1202_s27  ;;  %p1208_p7 = scmp.lt.s32.totalorder %s1202_s27, %s1202_s27 }
  0x31   :  { %p1209_p8 = por %p1208_p7, %p1207_p6 }
  0x33   :  { %p1210_p9 = pnand %p1209_p8, %p1203_p5 }
  0x35   :  { %1213 = shalt.err (!%p1210_p9)
}
  0x36   :  { %s1271_s1 = smov 64   ;;  %s1272_s28 = smov 4  }
  0x37   :  { %61 = dma.hbm_to_vmem [thread:$0]  %s1427_s5, 2048, %s56_s11, [#allocation7], %s1271_s1, %s1271_s1, %s1272_s28  }
  0x38   :  { %1258 = dma.done.wait [#allocation4], 128  }
  0x39   :  { %1259 = vsyncadd [#allocation4], 4294967168 }
  0x3a   :  { %1260 = dma.done.wait [#allocation7], 10240  }
  0x3b   :  { %1261 = vsyncadd [#allocation7], 4294957056  ;;  %v1273_v1 = vmov 0   ;;  %v79_v2 = vld [vmem:[#allocation3] sm:$0xff]  ;;  %vm101_vm0 = vcmask 1043456   ;;  %vm97_vm1 = vcmask 64512  }
  0x3c   :  { %140 = vmatprep.mubr.bf16.mxu0 %v1273_v1  ;;  %1032 = vset.pattern.permute.xlu1 %v1273_v1  ;;  %v913_v3 = vcombine.high %v79_v2, %v79_v2  ;;  %v912_v4 = vcombine.low %v79_v2, %v79_v2  ;;  %v1036_v5 = vld [vmem:[#allocation6 + $0x4] ss:$16 sps:$4 sm:$0xff]   ;;  %v1038_v7 = vld [vmem:[#allocation6 + $0x8] ss:$16 sps:$4 sm:$0xff]   ;;  %v1040_v8 = vld [vmem:[#allocation6 + $0xc] ss:$16 sps:$4 sm:$0xff]  }
  0x3d   :  { %1033 = vset.pattern.permute.xlu0 %v1273_v1  ;;  %v78_v6 = vld [vmem:[%s1422_s0] sm:$0x1]  ;;  %563 = vmatprep.subr.bf16.mxu1 %v1036_v5  ;;  %v1041_v10 = vld [vmem:[#allocation6] ss:$16 sps:$4 sm:$0xff]   ;;  %v1046_v12 = vld [vmem:[#allocation6 + $0x2c] ss:$16 sps:$4 sm:$0xff]  }
  0x3e   :  { %914 = vmatprep.subr.msk.bf16.mxu0 %vm101_vm0, %v913_v3  ;;  %v103_v9 = vsel %vm101_vm0, %v912_v4, 0  ;;  %v1042_v11 = vld [vmem:[#allocation6 + $0x24] ss:$16 sps:$4 sm:$0xff]   ;;  %564 = vmatpush1.bf16.msra.mxu1 %v1041_v10  ;;  %v1047_v13 = vld [vmem:[#allocation6 + $0x20] ss:$16 sps:$4 sm:$0xff]   ;;  %vm848_vm8 = vcmask 1041408  }
  0x3f   :  { %109 = vmatpush1.bf16.msra.mxu0 %v103_v9  ;;  %565 = vmatprep.subr.bf16.mxu1 %v1042_v11  ;;  %v1048_v14 = vld [vmem:[#allocation6 + $0x44] ss:$16 sps:$4 sm:$0xff]   ;;  %v1044_v15 = vld [vmem:[#allocation6 + $0x28] ss:$16 sps:$4 sm:$0xff]   ;;  %v1052_v16 = vld [vmem:[#allocation6 + $0x4c] ss:$16 sps:$4 sm:$0xff]  }
  0x40   :  { %604 = vmatprep.subr.bf16.mxu0 %v1040_v8  ;;  %v1053_v17 = vld [vmem:[#allocation6 + $0x40] ss:$16 sps:$4 sm:$0xff]   ;;  %v1054_v18 = vld [vmem:[#allocation6 + $0x64] ss:$16 sps:$4 sm:$0xff]   ;;  %v1050_v19 = vld [vmem:[#allocation6 + $0x48] ss:$16 sps:$4 sm:$0xff]   ;;  %v82_v8 = vlaneseq }
  0x41   :  { %v1058_v20 = vld [vmem:[#allocation6 + $0x6c] ss:$16 sps:$4 sm:$0xff]   ;;  %v1059_v21 = vld [vmem:[#allocation6 + $0x60] ss:$16 sps:$4 sm:$0xff]   ;;  %v1060_v22 = vld [vmem:[#allocation6 + $0x84] ss:$16 sps:$4 sm:$0xff]  }
  0x42   :  { %915 = vmatmul.mubr.msk.bf16.vlgmr.msra.gmra.mrb[0].mxu0 %vm97_vm1, %v78_v6  ;;  %566 = vmatpush1.bf16.msra.mxu1 %v1047_v13  ;;  %v1056_v23 = vld [vmem:[#allocation6 + $0x68] ss:$16 sps:$4 sm:$0xff]   ;;  %v1064_v24 = vld [vmem:[#allocation6 + $0x8c] ss:$16 sps:$4 sm:$0xff]   ;;  %v1065_v25 = vld [vmem:[#allocation6 + $0x80] ss:$16 sps:$4 sm:$0xff]  }
  0x43   :  { %605 = vmatpush1.bf16.msra.mxu0 %v1038_v7  ;;  %567 = vmatprep.subr.bf16.mxu1 %v1048_v14  ;;  %v1066_v26 = vld [vmem:[#allocation6 + $0xa4] ss:$16 sps:$4 sm:$0xff]   ;;  %v1062_v27 = vld [vmem:[#allocation6 + $0x88] ss:$16 sps:$4 sm:$0xff]   ;;  %v1070_v28 = vld [vmem:[#allocation6 + $0xac] ss:$16 sps:$4 sm:$0xff]  }
  0x44   :  { %606 = vmatprep.subr.bf16.mxu0 %v1046_v12  ;;  %v1071_v29 = vld [vmem:[#allocation6 + $0xa0] ss:$16 sps:$4 sm:$0xff]   ;;  %v1072_v30 = vld [vmem:[#allocation6 + $0xc4] ss:$16 sps:$4 sm:$0xff]   ;;  %v1068_v31 = vld [vmem:[#allocation6 + $0xa8] ss:$16 sps:$4 sm:$0xff]  }
  0x45   :  { %v1076_v32 = vld [vmem:[#allocation6 + $0xcc] ss:$16 sps:$4 sm:$0xff]   ;;  %v1077_v33 = vld [vmem:[#allocation6 + $0xc0] ss:$16 sps:$4 sm:$0xff]   ;;  %v1078_v34 = vld [vmem:[#allocation6 + $0xe4] ss:$16 sps:$4 sm:$0xff]  }
  0x46   :  { %568 = vmatpush1.bf16.msra.mxu1 %v1053_v17  ;;  %v1074_v35 = vld [vmem:[#allocation6 + $0xc8] ss:$16 sps:$4 sm:$0xff]   ;;  %v1082_v36 = vld [vmem:[#allocation6 + $0xec] ss:$16 sps:$4 sm:$0xff]   ;;  %v1083_v37 = vld [vmem:[#allocation6 + $0xe0] ss:$16 sps:$4 sm:$0xff]  }
  0x47   :  { %607 = vmatpush1.bf16.msra.mxu0 %v1044_v15  ;;  %569 = vmatprep.subr.bf16.mxu1 %v1054_v18  ;;  %v1084_v38 = vld [vmem:[#allocation6 + $0x104] ss:$16 sps:$4 sm:$0xff]   ;;  %v1080_v39 = vld [vmem:[#allocation6 + $0xe8] ss:$16 sps:$4 sm:$0xff]   ;;  %v1088_v40 = vld [vmem:[#allocation6 + $0x10c] ss:$16 sps:$4 sm:$0xff]  }
  0x48   :  { %608 = vmatprep.subr.bf16.mxu0 %v1052_v16  ;;  %v1089_v41 = vld [vmem:[#allocation6 + $0x100] ss:$16 sps:$4 sm:$0xff]   ;;  %v1090_v42 = vld [vmem:[#allocation6 + $0x124] ss:$16 sps:$4 sm:$0xff]   ;;  %v1086_v43 = vld [vmem:[#allocation6 + $0x108] ss:$16 sps:$4 sm:$0xff]  }
  0x49   :  { %v1094_v44 = vld [vmem:[#allocation6 + $0x12c] ss:$16 sps:$4 sm:$0xff]   ;;  %v1095_v45 = vld [vmem:[#allocation6 + $0x120] ss:$16 sps:$4 sm:$0xff]   ;;  %v1092_v46 = vld [vmem:[#allocation6 + $0x128] ss:$16 sps:$4 sm:$0xff]  }
  0x4a   :  { %570 = vmatpush1.bf16.msra.mxu1 %v1059_v21  ;;  %v1096_v47 = vld [vmem:[#allocation6 + $0x144] ss:$16 sps:$4 sm:$0xff]   ;;  %v1100_v48 = vld [vmem:[#allocation6 + $0x14c] ss:$16 sps:$4 sm:$0xff]   ;;  %v1101_v49 = vld [vmem:[#allocation6 + $0x140] ss:$16 sps:$4 sm:$0xff]  }
  0x4b   :  { %609 = vmatpush1.bf16.msra.mxu0 %v1050_v19  ;;  %571 = vmatprep.subr.bf16.mxu1 %v1060_v22  ;;  %v1102_v50 = vld [vmem:[#allocation6 + $0x164] ss:$16 sps:$4 sm:$0xff]   ;;  %v1098_v51 = vld [vmem:[#allocation6 + $0x148] ss:$16 sps:$4 sm:$0xff]   ;;  %v1106_v52 = vld [vmem:[#allocation6 + $0x16c] ss:$16 sps:$4 sm:$0xff]  }
  0x4c   :  { %610 = vmatprep.subr.bf16.mxu0 %v1058_v20  ;;  %v1107_v53 = vld [vmem:[#allocation6 + $0x160] ss:$16 sps:$4 sm:$0xff]   ;;  %v1108_v54 = vld [vmem:[#allocation6 + $0x184] ss:$16 sps:$4 sm:$0xff]   ;;  %v1104_v55 = vld [vmem:[#allocation6 + $0x168] ss:$16 sps:$4 sm:$0xff]  }
  0x4d   :  { %v1112_v56 = vld [vmem:[#allocation6 + $0x18c] ss:$16 sps:$4 sm:$0xff]   ;;  %v1113_v57 = vld [vmem:[#allocation6 + $0x180] ss:$16 sps:$4 sm:$0xff]   ;;  %v1114_v58 = vld [vmem:[#allocation6 + $0x1a4] ss:$16 sps:$4 sm:$0xff]  }
  0x4e   :  { %572 = vmatpush1.bf16.msra.mxu1 %v1065_v25  ;;  %v1110_v59 = vld [vmem:[#allocation6 + $0x188] ss:$16 sps:$4 sm:$0xff]   ;;  %v1118_v60 = vld [vmem:[#allocation6 + $0x1ac] ss:$16 sps:$4 sm:$0xff]   ;;  %v1119_v61 = vld [vmem:[#allocation6 + $0x1a0] ss:$16 sps:$4 sm:$0xff]  }
  0x4f   :  { %611 = vmatpush1.bf16.msra.mxu0 %v1056_v23  ;;  %573 = vmatprep.subr.bf16.mxu1 %v1066_v26  ;;  %v1116_v62 = vld [vmem:[#allocation6 + $0x1a8] ss:$16 sps:$4 sm:$0xff]   ;;  %v1120_v63 = vld [vmem:[#allocation6 + $0x1c4] ss:$16 sps:$4 sm:$0xff]   ;;  %v1124_v0 = vld [vmem:[#allocation6 + $0x1cc] ss:$16 sps:$4 sm:$0xff]  }
  0x50   :  { %612 = vmatprep.subr.bf16.mxu0 %v1064_v24  ;;  %v1122_v1 = vld [vmem:[#allocation6 + $0x1c8] ss:$16 sps:$4 sm:$0xff]   ;;  %v1125_v2 = vld [vmem:[#allocation6 + $0x1c0] ss:$16 sps:$4 sm:$0xff]   ;;  %v1126_v3 = vld [vmem:[#allocation6 + $0x1e4] ss:$16 sps:$4 sm:$0xff]  }
  0x51   :  { %v1128_v4 = vld [vmem:[#allocation6 + $0x1e8] ss:$16 sps:$4 sm:$0xff]   ;;  %v1130_v5 = vld [vmem:[#allocation6 + $0x1ec] ss:$16 sps:$4 sm:$0xff]   ;;  %v1131_v6 = vld [vmem:[#allocation6 + $0x1e0] ss:$16 sps:$4 sm:$0xff]  }
  0x52   :  { %574 = vmatpush1.bf16.msra.mxu1 %v1071_v29  ;;  %v1132_v7 = vld [vmem:[#allocation8 + $0x40] sm:$0xff]   ;;  %v83_v9 = vshrl.u32 %v82_v8, 7  ;;  %v80_v11 = vld [vmem:[%s1424_s2] sm:$0x3]  ;;  %v1135_v29 = vld [vmem:[#allocation8 + $0x8] sm:$0xff]   ;;  %s1274_s17 = smov [#allocation9]  }
  0x53   :  { %613 = vmatpush1.bf16.msra.mxu0 %v1062_v27  ;;  %575 = vmatprep.subr.bf16.mxu1 %v1072_v30  ;;  %v1133_v26 = vld [vmem:[#allocation8] sm:$0xff]   ;;  %v1136_v30 = vld [vmem:[#allocation8 + $0x50] sm:$0xff]   ;;  %s888_s18 = sshll.u32 %s1274_s17, 4  ;;  %s889_s18 = int_to_ptr.vmem [resolvable:$true] %s888_s18 }
  0x54   :  { %614 = vmatprep.subr.bf16.mxu0 %v1070_v28  ;;  %v1373_v10 = vsub.s32 0, %v83_v9  ;;  %v1378_v12 = vsub.s32 1, %v83_v9  ;;  %v1134_v28 = vld [vmem:[#allocation8 + $0x48] sm:$0xff]   ;;  %s1214_s19 = scalar_lea.vmem %s889_s18, 16  ;;  %s1218_s3 = scalar_lea.vmem %s889_s18, 32 }
  0x55   :  { %p1215_p10 = scmp.ne.s32.totalorder %s889_s18, %s1214_s19  ;;  %p1219_p11 = scmp.lt.s32.totalorder %s889_s18, %s889_s18 }
  0x56   :  { %576 = vmatpush1.bf16.msra.mxu1 %v1077_v33  ;;  %v85_v13 = vrot.slane %v80_v11, %v1373_v10  ;;  %v89_v14 = vrot.slane %v80_v11, %v1378_v12  ;;  %v1139_v33 = vld [vmem:[#allocation8 + $0x18] sm:$0xff]   ;;  %p1220_p12 = scmp.lt.s32.totalorder %s1218_s3, %s1214_s19 }
  0x57   :  { %615 = vmatpush1.bf16.msra.mxu0 %v1068_v31  ;;  %577 = vmatprep.subr.bf16.mxu1 %v1078_v34  ;;  %v1137_v31 = vld [vmem:[#allocation8 + $0x10] sm:$0xff]   ;;  %v1140_v34 = vld [vmem:[#allocation8 + $0x60] sm:$0xff]  }
  0x58   :  { %616 = vmatprep.subr.bf16.mxu0 %v1076_v32  ;;  %v1138_v32 = vld [vmem:[#allocation8 + $0x58] sm:$0xff]   ;;  %p1221_p13 = por %p1220_p12, %p1219_p11 }
  0x5a   :  { %578 = vmatpush1.bf16.msra.mxu1 %v1083_v37  ;;  %v1143_v37 = vld [vmem:[#allocation8 + $0x28] sm:$0xff]   ;;  %p1222_p0 = pnand %p1221_p13, %p1215_p10 }
  0x5b   :  { %617 = vmatpush1.bf16.msra.mxu0 %v1074_v35  ;;  %579 = vmatprep.subr.bf16.mxu1 %v1084_v38  ;;  %v1141_v35 = vld [vmem:[#allocation8 + $0x20] sm:$0xff]   ;;  %v1144_v38 = vld [vmem:[#allocation8 + $0x70] sm:$0xff]  }
  0x5c   :  { %618 = vmatprep.subr.bf16.mxu0 %v1082_v36  ;;  %v1142_v36 = vld [vmem:[#allocation8 + $0x68] sm:$0xff]  }
  0x5e   :  { %580 = vmatpush1.bf16.msra.mxu1 %v1089_v41  ;;  %v1147_v41 = vld [vmem:[#allocation8 + $0x38] sm:$0xff]  }
  0x5f   :  { %619 = vmatpush1.bf16.msra.mxu0 %v1080_v39  ;;  %581 = vmatprep.subr.bf16.mxu1 %v1090_v42  ;;  %v1145_v39 = vld [vmem:[#allocation8 + $0x30] sm:$0xff]   ;;  %v233_v42 = vsub.s32 2, %v83_v9 }
  0x60   :  { %620 = vmatprep.subr.bf16.mxu0 %v1088_v40  ;;  %v1146_v40 = vld [vmem:[#allocation8 + $0x78] sm:$0xff]  }
  0x62   :  { %582 = vmatpush1.bf16.msra.mxu1 %v1095_v45 }
  0x63   :  { %621 = vmatpush1.bf16.msra.mxu0 %v1086_v43  ;;  %583 = vmatprep.subr.bf16.mxu1 %v1096_v47  ;;  %v221_v43 = vld [vmem:[%s1426_s4] sm:$0xf] }
  0x64   :  { %622 = vmatprep.subr.bf16.mxu0 %v1094_v44  ;;  %v237_v44 = vsub.s32 3, %v83_v9  ;;  %v226_v45 = vrot.slane %v221_v43, %v1373_v10  ;;  %v230_v47 = vrot.slane %v221_v43, %v1378_v12 }
  0x66   :  { %584 = vmatpush1.bf16.msra.mxu1 %v1101_v49  ;;  %v834_v49 = vld [vmem:[%s1429_s7] sm:$0x3] }
  0x67   :  { %623 = vmatpush1.bf16.msra.mxu0 %v1092_v46  ;;  %585 = vmatprep.subr.bf16.mxu1 %v1102_v50  ;;  %v234_v46 = vrot.slane %v221_v43, %v233_v42 }
  0x68   :  { %624 = vmatprep.subr.bf16.mxu0 %v1100_v48  ;;  %v238_v48 = vrot.slane %v221_v43, %v237_v44 }
  0x6a   :  { %586 = vmatpush1.bf16.msra.mxu1 %v1107_v53 }
  0x6b   :  { %625 = vmatpush1.bf16.msra.mxu0 %v1098_v51  ;;  %587 = vmatprep.subr.bf16.mxu1 %v1108_v54 }
  0x6c   :  { %626 = vmatprep.subr.bf16.mxu0 %v1106_v52 }
  0x6e   :  { %588 = vmatpush1.bf16.msra.mxu1 %v1113_v57 }
  0x6f   :  { %627 = vmatpush1.bf16.msra.mxu0 %v1104_v55  ;;  %589 = vmatprep.subr.bf16.mxu1 %v1114_v58 }
  0x70   :  { %628 = vmatprep.subr.bf16.mxu0 %v1112_v56 }
  0x72   :  { %590 = vmatpush1.bf16.msra.mxu1 %v1119_v61  ;;  %v843_v61 = vrot.slane %v834_v49, %v1378_v12 }
  0x73   :  { %629 = vmatpush1.bf16.msra.mxu0 %v1110_v59  ;;  %591 = vmatprep.subr.bf16.mxu1 %v1120_v63 }
  0x74   :  { %630 = vmatprep.subr.bf16.mxu0 %v1118_v60  ;;  %v839_v60 = vrot.slane %v834_v49, %v1373_v10 }
  0x76   :  { %592 = vmatpush1.bf16.msra.mxu1 %v1125_v2 }
  0x77   :  { %631 = vmatpush1.bf16.msra.mxu0 %v1116_v62  ;;  %593 = vmatprep.subr.bf16.mxu1 %v1126_v3 }
  0x78   :  { %632 = vmatprep.subr.bf16.mxu0 %v1124_v0 }
  0x7a   :  { %594 = vmatpush1.bf16.msra.mxu1 %v1131_v6 }
  0x7b   :  { %633 = vmatpush1.bf16.msra.mxu0 %v1122_v1  ;;  %998 = vmatprep.subr.bf16.mxu1 %v1132_v7 }
  0x7c   :  { %634 = vmatprep.subr.bf16.mxu0 %v1130_v5 }
  0x7f   :  { %635 = vmatpush1.bf16.msra.mxu0 %v1128_v4 }
 0x115   :  { %v142_v15 = vpop.f32.mrb[0].mxu0 }
 0x116   :  { %v143_v16 = vadd.f32 %v142_v15, %v85_v13  ;;  %v144_v17 = vpop.f32.mrb[1].mxu0  ;;  %v997_v15 = vld [vmem:[#allocation2] ss:$0 sm:$0xff] }
 0x117   :  { %v145_v18 = vadd.f32 %v144_v17, %v89_v14  ;;  %v146_v19 = vpop.f32.mrb[2].mxu0 }
 0x118   :  { %vm149_vm2 = vcmp.gt.f32.partialorder %v143_v16, 0.0  ;;  %v151_v20 = vmul.f32 0.01, %v143_v16  ;;  %v147_v21 = vpop.f32.mrb[3].mxu0 }
 0x119   :  { %v152_v22 = vmul.f32 0.01, %v145_v18  ;;  %vm150_vm3 = vcmp.gt.f32.partialorder %v145_v18, 0.0 }
 0x11a   :  { %v153_v23 = vsel %vm149_vm2, %v143_v16, %v151_v20  ;;  %v980_v20 = vld [vmem:[%s1428_s6] ss:$0 sm:$0xff] }
 0x11b   :  { %v154_v24 = vsel %vm150_vm3, %v145_v18, %v152_v22  ;;  %v155_v27 = vpack.c.bf16 %v153_v23, %v153_v23 }
 0x11c   :  { %v156_v25 = vpack.c.bf16 %v154_v24, %v154_v24 }
 0x11e   :  { %595 = vmatprep.mubr.bf16.mxu1 %v156_v25  ;;  %636 = vmatprep.mubr.bf16.mxu0 %v156_v25 }
 0x11f   :  { %596 = vmatmul.mubr.bf16.vlgmr.msra.gmra.mrb[0].mxu1 %v155_v27  ;;  %637 = vmatmul.mubr.bf16.vlgmr.msra.gmra.mrb[4].mxu0 %v155_v27 }
 0x120   :  { %999 = vmatpush3.bf16.msra.mxu1 %v1133_v26 }
 0x121   :  { %1000 = vmatprep.subr.bf16.mxu1 %v1134_v28 }
 0x124   :  { %1001 = vmatpush3.bf16.msra.mxu1 %v1135_v29 }
 0x125   :  { %1002 = vmatprep.subr.bf16.mxu1 %v1136_v30 }
 0x128   :  { %1003 = vmatpush3.bf16.msra.mxu1 %v1137_v31 }
 0x129   :  { %1004 = vmatprep.subr.bf16.mxu1 %v1138_v32 }
 0x12c   :  { %1005 = vmatpush3.bf16.msra.mxu1 %v1139_v33 }
 0x12d   :  { %1006 = vmatprep.subr.bf16.mxu1 %v1140_v34 }
 0x130   :  { %1007 = vmatpush3.bf16.msra.mxu1 %v1141_v35 }
 0x131   :  { %1008 = vmatprep.subr.bf16.mxu1 %v1142_v36 }
 0x134   :  { %1009 = vmatpush3.bf16.msra.mxu1 %v1143_v37 }
 0x135   :  { %1010 = vmatprep.subr.bf16.mxu1 %v1144_v38 }
 0x138   :  { %1011 = vmatpush3.bf16.msra.mxu1 %v1145_v39 }
 0x139   :  { %1012 = vmatprep.subr.bf16.mxu1 %v1146_v40 }
 0x13c   :  { %1013 = vmatpush3.bf16.msra.mxu1 %v1147_v41 }
 0x1f2   :  { %v597_v50 = vpop.f32.mrb[0].mxu1  ;;  %v638_v51 = vpop.f32.mrb[4].mxu0 }
 0x1f3   :  { %v598_v52 = vadd.f32 %v597_v50, %v226_v45  ;;  %v639_v53 = vadd.f32 %v638_v51, %v234_v46  ;;  %v599_v54 = vpop.f32.mrb[1].mxu1  ;;  %v640_v55 = vpop.f32.mrb[5].mxu0 }
 0x1f4   :  { %v600_v56 = vadd.f32 %v599_v54, %v230_v47  ;;  %v641_v57 = vadd.f32 %v640_v55, %v238_v48  ;;  %v601_v58 = vpop.f32.mrb[2].mxu1  ;;  %v642_v59 = vpop.f32.mrb[6].mxu0 }
 0x1f5   :  { %vm645_vm4 = vcmp.gt.f32.partialorder %v598_v52, 0.0  ;;  %v649_v62 = vmul.f32 0.01, %v598_v52  ;;  %vm647_vm5 = vcmp.gt.f32.partialorder %v639_v53, 0.0  ;;  %v651_v63 = vmul.f32 0.01, %v639_v53 }
 0x1f6   :  { %vm646_vm6 = vcmp.gt.f32.partialorder %v600_v56, 0.0  ;;  %v650_v0 = vmul.f32 0.01, %v600_v56  ;;  %vm648_vm7 = vcmp.gt.f32.partialorder %v641_v57, 0.0  ;;  %v652_v1 = vmul.f32 0.01, %v641_v57 }
 0x1f7   :  { %v653_v2 = vsel %vm645_vm4, %v598_v52, %v649_v62  ;;  %v602_v3 = vpop.f32.mrb[3].mxu1  ;;  %v643_v4 = vpop.f32.mrb[7].mxu0  ;;  %v655_v5 = vsel %vm647_vm5, %v639_v53, %v651_v63 }
 0x1f8   :  { %v654_v6 = vsel %vm646_vm6, %v600_v56, %v650_v0  ;;  %v656_v7 = vsel %vm648_vm7, %v641_v57, %v652_v1  ;;  %v846_v8 = vmul.f32 %v839_v60, %v655_v5  ;;  %v657_v11 = vpack.c.bf16 %v653_v2, %v653_v2 }
 0x1f9   :  { %v658_v9 = vpack.c.bf16 %v654_v6, %v654_v6  ;;  %v847_v10 = vmul.f32 %v843_v61, %v656_v7 }
 0x1fa   :  { %v849_v12 = vsel %vm848_vm8, %v846_v8, 0.0 }
 0x1fb   :  { %826 = vmatprep.mubr.bf16.mxu1 %v658_v9  ;;  %v850_v13 = vsel %vm848_vm8, %v847_v10, 0.0 }
 0x1fc   :  { %827 = vmatmul.mubr.bf16.vlgmr.msra.gmra.mrb[4].mxu1 %v657_v11  ;;  %v851_v14 = vadd.f32 %v850_v13, %v849_v12 }
 0x1fe   :  { %852 = vadd.xlane.f32.xlu0 %v851_v14 }
 0x28b   :  { %v853_v16 = vpop.xlane.xlu0 %852 }
 0x28c   :  { %v861_v17 = vadd.f32 %v997_v15, %v853_v16 }
 0x28e   :  { %864 = vperm.xlu1 %1032, %v861_v17  }
 0x2cf   :  { %v1014_v18 = vpop.f32.mrb[4].mxu1 }
 0x2d0   :  { %v1015_v19 = vpop.f32.mrb[5].mxu1 }
 0x2d1   :  { %v1016_v21 = vadd.f32 %v1015_v19, %v1014_v18  ;;  %v1017_v22 = vpop.f32.mrb[6].mxu1 }
 0x2d2   :  { %v1018_v23 = vpop.f32.mrb[7].mxu1 }
 0x2d3   :  { %v829_v24 = vadd.f32 %v1016_v21, %v980_v20 }
 0x2d5   :  { %v870_v25 = vsel %vm848_vm8, %v829_v24, 0.0 }
 0x2d6   :  { %871 = vadd.xlane.f32.xlu0 %v870_v25 }
 0x30d   :  { %v865_v26 = vpop.permute.xlu1 %864 }
 0x30e   :  { %v867_v27 = vadd.f32 %v865_v26, %v829_v24 }
 0x310   :  { %v868_v28 = vpack.c.bf16 %v867_v27, %v867_v27 }
 0x312   :  { %869 = vst [vmem:[#allocation9] sm:$0x1] %v868_v28 }
 0x313   :  { %1225 = shalt.err (!%p1222_p0)
}
 0x314   :  { %s1226_s20 = scalar_lea.hbm %s1431_s9, 16 }
 0x315   :  { %p1227_p1 = scmp.ne.s32.totalorder %s1431_s9, %s1226_s20  ;;  %p1230_p2 = scmp.lt.u32.totalorder %s1226_s20, %s1431_s9 }
 0x317   :  { %p1232_p3 = pnand %p1230_p2, %p1227_p1 }
 0x319   :  { %1235 = shalt.err (!%p1232_p3)
}
 0x31a   :  { %891 = dma.vmem_to_hbm [thread:$0]  %s889_s18, 16, %s1431_s9, [#allocation5]  }
 0x31b   :  { %s1275_s26 = smov [#allocation10]  }
 0x31c   :  { %s898_s27 = sshll.u32 %s1275_s26, 4  ;;  %s899_s27 = int_to_ptr.vmem [resolvable:$true] %s898_s27 }
 0x31d   :  { %s1236_s28 = scalar_lea.vmem %s899_s27, 16  ;;  %s1240_s29 = scalar_lea.vmem %s899_s27, 32 }
 0x31e   :  { %p1237_p4 = scmp.ne.s32.totalorder %s899_s27, %s1236_s28  ;;  %p1241_p5 = scmp.lt.s32.totalorder %s899_s27, %s899_s27 }
 0x31f   :  { %p1242_p6 = scmp.lt.s32.totalorder %s1240_s29, %s1236_s28 }
 0x321   :  { %p1243_p7 = por %p1242_p6, %p1241_p5 }
 0x323   :  { %p1244_p8 = pnand %p1243_p7, %p1237_p4 }
 0x363   :  { %v872_v29 = vpop.xlane.xlu0 %871 }
 0x364   :  { %v873_v30 = vrot.slane %v872_v29, 4 }
 0x366   :  { %v874_v31 = vadd.f32 %v873_v30, %v872_v29 }
 0x368   :  { %v875_v32 = vrot.slane %v874_v31, 2 }
 0x36a   :  { %v876_v33 = vadd.f32 %v875_v32, %v874_v31 }
 0x36c   :  { %v877_v34 = vrot.slane %v876_v33, 1 }
 0x36e   :  { %v878_v35 = vadd.f32 %v877_v34, %v876_v33 }
 0x370   :  { %1020 = vpush %v878_v35 }
 0x3a1   :  { %s1021_s1 = spop %1020 }
 0x3a2   :  { %v880_v36 = vstv %s1021_s1 }
 0x3a3   :  { %881 = vst [vmem:[#allocation10] sm:$0x1] %v880_v36 }
 0x3a4   :  { %1247 = shalt.err (!%p1244_p8)
}
 0x3a5   :  { %s1248_s12 = scalar_lea.hbm %s1432_s10, 16 }
 0x3a6   :  { %p1249_p9 = scmp.ne.s32.totalorder %s1432_s10, %s1248_s12  ;;  %p1252_p10 = scmp.lt.u32.totalorder %s1248_s12, %s1432_s10 }
 0x3a8   :  { %p1254_p11 = pnand %p1252_p10, %p1249_p9 }
 0x3aa   :  { %1257 = shalt.err (!%p1254_p11)
}
 0x3ab   :  { %901 = dma.vmem_to_hbm [thread:$0]  %s899_s27, 16, %s1432_s10, [#allocation11]  }
 0x3ac   :  { %1262 = dma.done.wait [#allocation5], 16  }
 0x3ad   :  { %1263 = vsyncadd [#allocation5], 4294967280 }
 0x3ae   :  { %1264 = dma.done.wait [#allocation11], 16  }
 0x3af   :  { %1265 = vsyncadd [#allocation11], 4294967280 }
 0x3b0   :  { %908 = vsyncpa [#allocation4], 1 }
 0x3b1   :  { %909 = vsyncpa [#allocation7], 1 }
 0x3b2   :  { %910 = vsyncpa [#allocation5], 1 }
 0x3b3   :  { %911 = vsyncpa [#allocation11], 1 }

</bundles_post_ra>
